<compile_context>
chip_gen: v7x
topology: tpu7x:2x2x1
jax: 0.10.0
libtpu: 0.0.40
codegen_flags: <defaults>
</compile_context>

<pallas_src>
import functools

import jax
import jax.numpy as jnp
from jax.experimental import pallas as pl
from jax.experimental.pallas import tpu as pltpu

EPS = 1e-3  # BatchNorm eps in the PyTorch module


# --------------------------------------------------------------------------- #
# pltpu.roll direction probe (one-time, tiny, cached)
# --------------------------------------------------------------------------- #
_ROLL_LIKE_NP = None


def _roll_follows_np():
    """Probe whether pltpu.roll follows np.roll semantics (cached, one time)."""
    global _ROLL_LIKE_NP
    if _ROLL_LIKE_NP is None:
        def k(x_ref, o_ref):
            o_ref[...] = pltpu.roll(x_ref[...], shift=1, axis=1)

        x = jnp.tile(jnp.arange(128, dtype=jnp.float32)[None, :], (8, 1))
        y = pl.pallas_call(
            k, out_shape=jax.ShapeDtypeStruct((8, 128), jnp.float32))(x)
        # np.roll semantics: result[0] == x[-1] == 127
        _ROLL_LIKE_NP = bool(y[0, 0] == 127.0)
    return _ROLL_LIKE_NP


def _default_images_per_step(N):
    """Whole batch per step on single-TC chips (v5e/v6e); split the batch over
    two parallel grid steps on v7x so both TensorCores get work."""
    try:
        kind = jax.devices()[0].device_kind.lower()
    except Exception:
        kind = ""
    if "v7" in kind and N >= 2 and N % 2 == 0:
        return N // 2
    return max(N, 1)


# --------------------------------------------------------------------------- #
# Fused C3k2 kernel (n_blk images per grid step, lane-folded)
# --------------------------------------------------------------------------- #

def _c3k2_kernel(x_ref, w_ref, b_ref, mask_ref, o_ref, taps_ref, *,
                 c1, c, c2, W, L, roll_like_np):
    def silu(v):
        return v * jax.nn.sigmoid(v)

    # Static views out of the packed weight / bias slabs.
    W1 = w_ref[0:2 * c, 0:c1]                       # cv1          (2c, c1)
    Wm1 = w_ref[2 * c:3 * c, 0:9 * c]               # m.cv1 3x3    (c, 9c)
    Wm2 = w_ref[3 * c:4 * c, 0:9 * c]               # m.cv2 3x3    (c, 9c)
    W2a = w_ref[4 * c:4 * c + c2, 0:2 * c]          # cv2 on [y1;y2] (c2, 2c)
    W2b = w_ref[4 * c + c2:4 * c + 2 * c2, 0:c]     # cv2 on z       (c2, c)
    b1 = b_ref[0:2 * c]
    bm1 = b_ref[2 * c:3 * c]
    bm2 = b_ref[3 * c:4 * c]
    b2 = b_ref[4 * c:4 * c + c2]

    x = x_ref[...]                                   # (c1, L) f32, lane-dense

    # cv1: one 1x1 conv (BN folded) + SiLU; halves sliced afterwards.
    y = silu(jnp.dot(W1, x, preferred_element_type=jnp.float32) + b1)  # (2c,L)
    y2 = y[c:2 * c, :]                                                  # (c,L)

    def conv3x3_silu(a, wflat, bias):
        # Stack the 9 taps on the contraction axis -> single (c,9c)x(9c,L) dot.
        i = 0
        m = 0
        for dy in (-1, 0, 1):
            for dx in (-1, 0, 1):
                s = dy * W + dx
                if s == 0:
                    taps_ref[i:i + c, :] = a
                else:
                    k = (-s) % L if roll_like_np else s % L
                    taps_ref[i:i + c, :] = (
                        pltpu.roll(a, shift=k, axis=1) * mask_ref[m:m + 1, :])
                    m += 1
                i += c
        return silu(jnp.dot(wflat, taps_ref[...],
                            preferred_element_type=jnp.float32) + bias)

    # m[0]: Bottleneck(c, c, shortcut=True, k=((3,3),(3,3)), e=1.0)
    t1 = conv3x3_silu(y2, Wm1, bm1)
    z = y2 + conv3x3_silu(t1, Wm2, bm2)

    # cv2 on concat([y1, y2, z]) -- concat-free via the split weight.
    o = (jnp.dot(W2a, y, preferred_element_type=jnp.float32)
         + jnp.dot(W2b, z, preferred_element_type=jnp.float32)
         + b2)
    o_ref[...] = silu(o)


# --------------------------------------------------------------------------- #
# Jitted wrapper
# --------------------------------------------------------------------------- #

@functools.partial(
    jax.jit, static_argnames=("c", "c2", "images_per_step", "roll_like_np"))
def _c3k2_impl(x_nchw, w_slab, b_slab, *, c, c2, images_per_step,
               roll_like_np):
    N, c1, H, W = x_nchw.shape
    HW = H * W
    nb = images_per_step
    if N % nb != 0:
        nb = N
    G = N // nb
    L = nb * HW

    # NCHW -> channel-major lane-dense (C1, N*HW); image n is lanes
    # [n*HW, (n+1)*HW).  Tiny transpose, one HBM pass, fused under jit.
    x = jnp.transpose(x_nchw.reshape(N, c1, HW), (1, 0, 2)).reshape(c1, N * HW)
    x = x.astype(jnp.float32)

    # Boundary masks for the 8 non-center 3x3 taps, built with per-image
    # coordinates (col % HW) so a lane roll can never leak across images.
    # Constant-folded by XLA; enters the kernel as one (8, L) input.
    col = jnp.arange(L, dtype=jnp.int32) % HW
    hh = col // W
    ww = col % W
    rows = []
    for dy in (-1, 0, 1):
        for dx in (-1, 0, 1):
            if dy == 0 and dx == 0:
                continue
            m = jnp.ones((L,), jnp.bool_)
            if dy < 0:
                m = m & (hh >= -dy)
            if dy > 0:
                m = m & (hh < H - dy)
            if dx < 0:
                m = m & (ww >= -dx)
            if dx > 0:
                m = m & (ww < W - dx)
            rows.append(m)
    mask = jnp.stack(rows, 0).astype(jnp.float32)            # (8, L)

    kernel = functools.partial(_c3k2_kernel, c1=c1, c=c, c2=c2, W=W, L=L,
                               roll_like_np=roll_like_np)

    flops = 2 * N * HW * (c1 * 2 * c + 2 * 9 * c * c + 3 * c * c2)
    transc = N * HW * (4 * c + c2)
    bytes_acc = 4 * (x.size + N * c2 * HW + w_slab.size + b_slab.size
                     + mask.size)

    out = pl.pallas_call(
        kernel,
        out_shape=jax.ShapeDtypeStruct((c2, N * HW), jnp.float32),
        grid=(G,),
        in_specs=[
            pl.BlockSpec((c1, L), lambda g: (0, g)),           # activations
            pl.BlockSpec(w_slab.shape, lambda g: (0, 0)),      # packed weights
            pl.BlockSpec(b_slab.shape, lambda g: (0, 0)),      # packed biases
            pl.BlockSpec((8, L), lambda g: (0, 0)),            # tap masks
        ],
        out_specs=pl.BlockSpec((c2, L), lambda g: (0, g)),
        scratch_shapes=[pltpu.VMEM((9 * c, L), jnp.float32)],  # tap matrix
        compiler_params=pltpu.CompilerParams(
            dimension_semantics=("parallel",)),
        cost_estimate=pl.CostEstimate(flops=int(flops),
                                      transcendentals=int(transc),
                                      bytes_accessed=int(bytes_acc)),
    )(x, w_slab, b_slab, mask)

    return jnp.transpose(out.reshape(c2, N, HW),
                         (1, 0, 2)).reshape(N, c2, H, W)


def c3k2_forward(x_nchw, P, images_per_step=None):
    """Fused C3k2 forward.  x_nchw: (N, c1, H, W) -> (N, c2, H, W)."""
    N = x_nchw.shape[0]
    if images_per_step is None:
        images_per_step = _default_images_per_step(N)
    _, c, c2 = P["dims"]
    return _c3k2_impl(x_nchw, P["w_slab"], P["b_slab"],
                      c=c, c2=c2, images_per_step=int(images_per_step),
                      roll_like_np=_roll_follows_np())


# --------------------------------------------------------------------------- #
# Parameter init / BN folding / packed-slab layout
# --------------------------------------------------------------------------- #

def init_conv_bn(key, cout, cin, kh, kw):
    k1, k2, k3, k4, k5 = jax.random.split(key, 5)
    w = 0.1 * jax.random.normal(k1, (cout, cin, kh, kw), jnp.float32)  # OIHW
    gamma = 1.0 + 0.1 * jax.random.normal(k2, (cout,), jnp.float32)
    beta = 0.1 * jax.random.normal(k3, (cout,), jnp.float32)
    mean = 0.1 * jax.random.normal(k4, (cout,), jnp.float32)
    var = 0.5 + 0.5 * jnp.abs(jax.random.normal(k5, (cout,), jnp.float32))
    return dict(w=w, gamma=gamma, beta=beta, mean=mean, var=var)


def fuse_conv_bn(p):
    # Fold eval-mode BN into the (bias-free) conv.
    scale = p["gamma"] / jnp.sqrt(p["var"] + EPS)
    w = p["w"] * scale[:, None, None, None]          # (Cout, Cin, kh, kw)
    b = p["beta"] - p["mean"] * scale                # (Cout,)
    return w, b


def prepare_params(raw):
    cv1_w, cv1_b = fuse_conv_bn(raw["cv1"])     # (2c, c1, 1, 1), (2c,)
    m1_w, m1_b = fuse_conv_bn(raw["m_cv1"])     # (c, c, 3, 3),  (c,)
    m2_w, m2_b = fuse_conv_bn(raw["m_cv2"])
    cv2_w, cv2_b = fuse_conv_bn(raw["cv2"])     # (c2, 3c, 1, 1), (c2,)

    two_c, c1 = cv1_w.shape[0], cv1_w.shape[1]
    c = two_c // 2
    c2 = cv2_w.shape[0]

    w1 = cv1_w[:, :, 0, 0]                                        # (2c, c1)
    # 3x3 weights flattened so column index = (ky*3+kx)*c + cin -> matches the
    # tap-stacked (9c, L) scratch layout in the kernel.
    wm1 = jnp.transpose(m1_w, (0, 2, 3, 1)).reshape(c, 9 * c)
    wm2 = jnp.transpose(m2_w, (0, 2, 3, 1)).reshape(c, 9 * c)
    w2 = cv2_w[:, :, 0, 0]                                        # (c2, 3c)
    w2a = w2[:, :2 * c]                                           # acts on [y1;y2]
    w2b = w2[:, 2 * c:]                                           # acts on z

    ncols = max(c1, 9 * c, 2 * c)

    def pad(w):
        return jnp.pad(w, ((0, 0), (0, ncols - w.shape[1])))

    w_slab = jnp.concatenate(
        [pad(w1), pad(wm1), pad(wm2), pad(w2a), pad(w2b)], axis=0)  # (4c+2c2, ncols)
    b_slab = jnp.concatenate([cv1_b, m1_b, m2_b, cv2_b],
                             axis=0).reshape(-1, 1)                 # (4c+c2, 1)

    return {"w_slab": w_slab, "b_slab": b_slab, "dims": (c1, c, c2)}


# --------------------------------------------------------------------------- #
# Plain-JAX reference (for correctness check)
# --------------------------------------------------------------------------- #

def to_hwio(w_oihw):
    return jnp.transpose(w_oihw, (2, 3, 1, 0))


def _ref_conv_bn_silu(x_nhwc, raw, k):
    w, b = fuse_conv_bn(raw)
    y = jax.lax.conv_general_dilated(
        x_nhwc, to_hwio(w), window_strides=(1, 1),
        padding=[(k // 2, k // 2), (k // 2, k // 2)],
        dimension_numbers=("NHWC", "HWIO", "NHWC"))
    y = y + b
    return y * jax.nn.sigmoid(y)


def c3k2_reference(x_nchw, raw, c):
    x = jnp.transpose(x_nchw, (0, 2, 3, 1)).astype(jnp.float32)
    y = _ref_conv_bn_silu(x, raw["cv1"], 1)
    y1, y2 = y[..., :c], y[..., c:]
    t = _ref_conv_bn_silu(y2, raw["m_cv1"], 3)
    z = y2 + _ref_conv_bn_silu(t, raw["m_cv2"], 3)
    cat = jnp.concatenate([y1, y2, z], axis=-1)
    out = _ref_conv_bn_silu(cat, raw["cv2"], 1)
    return jnp.transpose(out, (0, 3, 1, 2))


# --------------------------------------------------------------------------- #
# Main
# --------------------------------------------------------------------------- #

if __name__ == "__main__":
    c1, c2, n = 4, 8, 1
    c = int(c2 * 0.5)

    key = jax.random.PRNGKey(0)
    kx, k1, k2, k3, k4 = jax.random.split(key, 5)

    x = jax.random.normal(kx, (2, c1, 16, 16), jnp.float32)  # NCHW, like PyTorch

    raw = {
        "cv1":   init_conv_bn(k1, 2 * c, c1, 1, 1),
        "m_cv1": init_conv_bn(k2, c, c, 3, 3),
        "m_cv2": init_conv_bn(k3, c, c, 3, 3),
        "cv2":   init_conv_bn(k4, c2, (2 + n) * c, 1, 1),
    }
    P = prepare_params(raw)

    out = jax.block_until_ready(c3k2_forward(x, P))
    ref = jax.block_until_ready(c3k2_reference(x, raw, c))

    assert out.shape == (2, c2, 16, 16), out.shape
    err = float(jnp.max(jnp.abs(out - ref)))
    assert jnp.allclose(out, ref, rtol=1e-4, atol=1e-4), err
    print("KERNEL_OK")
</pallas_src>

<mosaic_0001>
module attributes {stable_mosaic.version = 11 : i64} {
  func.func @k(%arg0: memref<8x128xf32, #tpu.memory_space<vmem>>, %arg1: memref<8x128xf32, #tpu.memory_space<vmem>>) attributes {dimension_semantics = [], scalar_prefetch = 0 : i64, scratch_operands = 0 : i64, tpu.core_type = #tpu.core_type<tc>} {
    %c0 = arith.constant 0 : index
    %c0_0 = arith.constant 0 : index
    %0 = vector.load %arg0[%c0, %c0_0] : memref<8x128xf32, #tpu.memory_space<vmem>>, vector<8x128xf32>
    %c1_i32 = arith.constant 1 : i32
    %1 = tpu.dynamic_rotate %0 by %c1_i32 dim 1 : vector<8x128xf32>, i32 -> vector<8x128xf32>
    %c0_1 = arith.constant 0 : index
    %c0_2 = arith.constant 0 : index
    %2 = vector.load %arg1[%c0_1, %c0_2] : memref<8x128xf32, #tpu.memory_space<vmem>>, vector<8x128xf32>
    tpu.vector_store %arg1[%c0_1, %c0_2], %1 {strides = array<i32>} : memref<8x128xf32, #tpu.memory_space<vmem>>, vector<8x128xf32>,
    return
  }
}

</mosaic_0001>

<bundles_post_ra>
// kernel: tpu_custom_call.1
= control target key start
LH: loop header
LB: loop body
LE: loop exit
PB: predicated region body
PF: predicated region fallthrough
CT: control target
= control target key end

     0   :  { %6 = vsyncpa [#allocation3], 0  ;;  %s128_s0 = inlined_call_operand.hbm [shape: f32[8,128], index: 0, kind: input, shape index: {}]   ;;  %s129_s1 = inlined_call_operand.hbm [shape: f32[8,128], index: 1, kind: output, shape index: {}]  }
   0x1   :  { %7 = vsyncpa [#allocation4], 0  ;;  %s91_s6 = smov [#allocation2]   ;;  %s43_s10 = scalar_lea.hbm %s128_s0, 128 }
   0x2   :  { %s14_s7 = sshll.u32 %s91_s6, 4  ;;  %p44_p0 = scmp.ne.s32.totalorder %s128_s0, %s43_s10  ;;  %s15_s7 = int_to_ptr.vmem [resolvable:$true] %s14_s7 }
   0x3   :  { %p47_p1 = scmp.lt.u32.totalorder %s43_s10, %s128_s0 }
   0x5   :  { %p49_p2 = pnand %p47_p1, %p44_p0 }
   0x7   :  { %52 = shalt.err (!%p49_p2)
}
   0x8   :  { %s53_s15 = scalar_lea.vmem %s15_s7, 128  ;;  %p58_p4 = scmp.lt.s32.totalorder %s15_s7, %s15_s7 }
   0x9   :  { %p54_p3 = scmp.ne.s32.totalorder %s15_s7, %s53_s15  ;;  %p59_p5 = scmp.lt.s32.totalorder %s53_s15, %s53_s15 }
   0xb   :  { %p60_p6 = por %p59_p5, %p58_p4 }
   0xd   :  { %p61_p7 = pnand %p60_p6, %p54_p3 }
   0xf   :  { %64 = shalt.err (!%p61_p7)
}
  0x10   :  { %17 = dma.hbm_to_vmem [thread:$0]  %s128_s0, 128, %s15_s7, [#allocation3]  }
  0x11   :  { %87 = dma.done.wait [#allocation3], 128  }
  0x12   :  { %88 = vsyncadd [#allocation3], 4294967168  ;;  %v21_v0 = vld [vmem:[#allocation2] sm:$0xff]  ;;  %s92_s18 = smov 1   ;;  %s93_s19 = smov [#allocation5]  }
  0x13   :  { %22 = vrot.lane.b32.xlu0 %v21_v0, %s92_s18  ;;  %s31_s20 = sshll.u32 %s93_s19, 4  ;;  %s32_s20 = int_to_ptr.vmem [resolvable:$true] %s31_s20 }
  0x14   :  { %s65_s21 = scalar_lea.vmem %s32_s20, 128  ;;  %p70_p9 = scmp.lt.s32.totalorder %s32_s20, %s32_s20 }
  0x15   :  { %p66_p8 = scmp.ne.s32.totalorder %s32_s20, %s65_s21  ;;  %p71_p10 = scmp.lt.s32.totalorder %s65_s21, %s65_s21 }
  0x17   :  { %p72_p11 = por %p71_p10, %p70_p9 }
  0x19   :  { %p73_p12 = pnand %p72_p11, %p66_p8 }
  0x85   :  { %v23_v1 = vpop.permute.xlu0 %22 }
  0x86   :  { %24 = vst [vmem:[#allocation5] sm:$0xff] %v23_v1 }
  0x87   :  { %76 = shalt.err (!%p73_p12)
}
  0x88   :  { %s77_s0 = scalar_lea.hbm %s129_s1, 128 }
  0x89   :  { %p78_p13 = scmp.ne.s32.totalorder %s129_s1, %s77_s0  ;;  %p81_p0 = scmp.lt.u32.totalorder %s77_s0, %s129_s1 }
  0x8b   :  { %p83_p1 = pnand %p81_p0, %p78_p13 }
  0x8d   :  { %86 = shalt.err (!%p83_p1)
}
  0x8e   :  { %34 = dma.vmem_to_hbm [thread:$0]  %s32_s20, 128, %s129_s1, [#allocation4]  }
  0x8f   :  { %89 = dma.done.wait [#allocation4], 128  }
  0x90   :  { %90 = vsyncadd [#allocation4], 4294967168 }
  0x91   :  { %38 = vsyncpa [#allocation3], 1 }
  0x92   :  { %39 = vsyncpa [#allocation4], 1 }

</bundles_post_ra>
